<compile_context>
chip_gen: v6e
topology: v6e:2x2x1
jax: 0.10.0
libtpu: 0.0.40
codegen_flags: <defaults>
</compile_context>

<pallas_src>
import jax
import jax.numpy as jnp
from jax import lax
from jax.experimental import pallas as pl
from jax.experimental.pallas import tpu as pltpu


def _mlp_kernel(x_ref, w1_ref, b1_ref, w2_ref, b2_ref, w3t_ref, b3_ref, o_ref):
    # x_ref : (bt, dim_in)   natural batch-major tile (no wrapper transpose)
    # w1    : (32, dim_in)   PyTorch (out, in) layout
    # b1,b2 : (32, 1)        columns -> broadcast over the lane (batch) dim
    # w3t   : (32, dim_out)  = w3.T (tiny, pre-transposed in the wrapper)
    # b3    : (1, dim_out)   row -> broadcast over the sublane (batch) dim
    # o_ref : (bt, dim_out)  batch-major output tile
    x = x_ref[...]

    # Layer 1: h1 = W1 @ x^T — the dim_in contraction is folded into the
    # matmul (rhs-transposed dot), so the big x tile is never transposed
    # explicitly.  Result is lane-dense: batch in lanes, hidden in sublanes.
    h1 = lax.dot_general(
        w1_ref[...], x, (((1,), (1,)), ((), ())),
        preferred_element_type=jnp.float32,
    ) + b1_ref[...]
    h1 = jnp.maximum(h1, 0.0)

    # Layer 2: stays lane-dense.
    h2 = jnp.dot(w2_ref[...], h1, preferred_element_type=jnp.float32) + b2_ref[...]
    h2 = jnp.maximum(h2, 0.0)

    # Layer 3: flip back to batch-major through the MXU and store directly.
    # Masked dim_out-lane stores are far cheaper than an extra HBM transpose
    # pass outside the kernel.
    o_ref[...] = jnp.dot(
        h2.T, w3t_ref[...], preferred_element_type=jnp.float32
    ) + b3_ref[...]


def _pick_batch_tile(B, batch_tile):
    """Lane/sublane-friendly batch tile; >=2 tiles once B > 256 so v7x's two
    TensorCores both get work (no-op on single-TC v5e/v6e)."""
    if B <= 256:
        return B                         # tiny batch: single block
    half = (B // 2 // 128) * 128         # ~half the batch, 128-aligned
    return max(128, min(batch_tile, half))


def mlp_forward(x, params, *, batch_tile=16384):
    """Fused MLP forward: x (B, dim_in) f32 -> (B, dim_out) f32.

    params: PyTorch-layout weights: w1 (32, dim_in), b1 (32,), w2 (32, 32),
    b2 (32,), w3 (dim_out, 32), b3 (dim_out,).
    """
    B, dim_in = x.shape
    dim_out = params["w3"].shape[0]

    bt = _pick_batch_tile(B, batch_tile)
    grid = (pl.cdiv(B, bt),)   # ragged last block handled by Pallas masking

    # Tiny one-time weight reshapes (<= 320 floats each) — negligible.
    b1 = params["b1"].reshape(-1, 1)
    b2 = params["b2"].reshape(-1, 1)
    w3t = params["w3"].T                  # (32, dim_out)
    b3 = params["b3"].reshape(1, -1)      # (1, dim_out)

    # x / out tiles march along the batch; weights & biases stay VMEM-resident
    # across the whole grid (index_map always returns block (0, 0)).
    x_spec = pl.BlockSpec((bt, dim_in), lambda i: (i, 0))
    o_spec = pl.BlockSpec((bt, dim_out), lambda i: (i, 0))
    resident = lambda arr: pl.BlockSpec(arr.shape, lambda i: (0, 0))

    return pl.pallas_call(
        _mlp_kernel,
        out_shape=jax.ShapeDtypeStruct((B, dim_out), jnp.float32),
        grid=grid,
        in_specs=[
            x_spec,
            resident(params["w1"]),
            resident(b1),
            resident(params["w2"]),
            resident(b2),
            resident(w3t),
            resident(b3),
        ],
        out_specs=o_spec,
        compiler_params=pltpu.CompilerParams(
            # Independent batch tiles -> shard across TCs on v7x.  Per-step
            # VMEM (~10 MiB at bt=16384, incl. double buffering) stays under
            # the scoped defaults on v5e (16 MiB) and v6e/v7x (32 MiB).
            dimension_semantics=("parallel",),
        ),
    )(x, params["w1"], b1, params["w2"], b2, w3t, b3)


def init_params(key, dim_in, dim_out, hidden=32):
    """Deterministic init mimicking PyTorch nn.Linear (U(-1/sqrt(fan_in), +)),
    with weights kept in PyTorch's (out_features, in_features) layout."""
    ks = jax.random.split(key, 6)

    def linear(kw, kb, fan_in, fan_out):
        bound = 1.0 / jnp.sqrt(float(fan_in))
        w = jax.random.uniform(kw, (fan_out, fan_in), jnp.float32, -bound, bound)
        b = jax.random.uniform(kb, (fan_out,), jnp.float32, -bound, bound)
        return w, b

    w1, b1 = linear(ks[0], ks[1], dim_in, hidden)
    w2, b2 = linear(ks[2], ks[3], hidden, hidden)
    w3, b3 = linear(ks[4], ks[5], hidden, dim_out)
    return dict(w1=w1, b1=b1, w2=w2, b2=b2, w3=w3, b3=b3)


def mlp_reference(x, p):
    h1 = jnp.maximum(x @ p["w1"].T + p["b1"], 0.0)
    h2 = jnp.maximum(h1 @ p["w2"].T + p["b2"], 0.0)
    return h2 @ p["w3"].T + p["b3"]


if __name__ == "__main__":
    key = jax.random.PRNGKey(0)
    k_x, k_p, k_x2 = jax.random.split(key, 3)

    # Small shapes consistent with the module: x is (B, dim_in).
    B, dim_in, dim_out = 8, 16, 10
    x = jax.random.normal(k_x, (B, dim_in), dtype=jnp.float32)
    params = init_params(k_p, dim_in, dim_out)

    out = jax.block_until_ready(mlp_forward(x, params))
    ref = mlp_reference(x, params)
    assert out.shape == (B, dim_out)
    assert jnp.allclose(out, ref, atol=1e-5, rtol=1e-5)

    # Multi-tile + ragged-batch path (grid > 1, partial last block, no padding).
    B2 = 300
    x2 = jax.random.normal(k_x2, (B2, dim_in), dtype=jnp.float32)
    out2 = jax.block_until_ready(mlp_forward(x2, params, batch_tile=128))
    ref2 = mlp_reference(x2, params)
    assert out2.shape == (B2, dim_out)
    assert jnp.allclose(out2, ref2, atol=1e-5, rtol=1e-5)

    print("KERNEL_OK")
</pallas_src>

<mosaic_0001>
module attributes {stable_mosaic.version = 11 : i64} {
  func.func @_mlp_kernel(%arg0: i32, %arg1: memref<8x16xf32, #tpu.memory_space<vmem>>, %arg2: memref<32x16xf32, #tpu.memory_space<vmem>>, %arg3: memref<32x1xf32, #tpu.memory_space<vmem>>, %arg4: memref<32x32xf32, #tpu.memory_space<vmem>>, %arg5: memref<32x1xf32, #tpu.memory_space<vmem>>, %arg6: memref<32x10xf32, #tpu.memory_space<vmem>>, %arg7: memref<1x10xf32, #tpu.memory_space<vmem>>, %arg8: memref<8x10xf32, #tpu.memory_space<vmem>>) attributes {dimension_semantics = [#tpu.dimension_semantics<parallel>], iteration_bounds = array<i64: 1>, scalar_prefetch = 0 : i64, scratch_operands = 0 : i64, tpu.core_type = #tpu.core_type<tc>, window_params = [{transform_indices = @transform_0, window_bounds = array<i64: 8, 16>}, {pipeline_mode = #tpu.pipeline_mode<synchronous>, transform_indices = @transform_1, window_bounds = array<i64: 32, 16>}, {pipeline_mode = #tpu.pipeline_mode<synchronous>, transform_indices = @transform_2, window_bounds = array<i64: 32, 1>}, {pipeline_mode = #tpu.pipeline_mode<synchronous>, transform_indices = @transform_3, window_bounds = array<i64: 32, 32>}, {pipeline_mode = #tpu.pipeline_mode<synchronous>, transform_indices = @transform_4, window_bounds = array<i64: 32, 1>}, {pipeline_mode = #tpu.pipeline_mode<synchronous>, transform_indices = @transform_5, window_bounds = array<i64: 32, 10>}, {pipeline_mode = #tpu.pipeline_mode<synchronous>, transform_indices = @transform_6, window_bounds = array<i64: 1, 10>}, {transform_indices = @transform_7, window_bounds = array<i64: 8, 10>}]} {
    %c0 = arith.constant 0 : index
    %c0_0 = arith.constant 0 : index
    %0 = vector.load %arg1[%c0, %c0_0] : memref<8x16xf32, #tpu.memory_space<vmem>>, vector<8x16xf32>
    %c0_1 = arith.constant 0 : index
    %c0_2 = arith.constant 0 : index
    %1 = vector.load %arg2[%c0_1, %c0_2] : memref<32x16xf32, #tpu.memory_space<vmem>>, vector<32x16xf32>
    %cst = arith.constant dense<0.000000e+00> : vector<32x8xf32>
    %2 = tpu.matmul %1, %0, %cst {dimension_numbers = #tpu.dot_dimension_numbers<[1], [1], [0], [0], [0, 0, 1, 0], [], []>} : vector<32x16xf32>, vector<8x16xf32>, vector<32x8xf32> -> vector<32x8xf32>
    %c0_3 = arith.constant 0 : index
    %c0_4 = arith.constant 0 : index
    %3 = vector.load %arg3[%c0_3, %c0_4] : memref<32x1xf32, #tpu.memory_space<vmem>>, vector<32x1xf32>
    %4 = vector.broadcast %3 : vector<32x1xf32> to vector<32x8xf32>
    %5 = arith.addf %2, %4 : vector<32x8xf32>
    %cst_5 = arith.constant 0.000000e+00 : f32
    %6 = vector.broadcast %cst_5 : f32 to vector<32x8xf32>
    %7 = arith.maximumf %5, %6 : vector<32x8xf32>
    %c0_6 = arith.constant 0 : index
    %c0_7 = arith.constant 0 : index
    %8 = vector.load %arg4[%c0_6, %c0_7] : memref<32x32xf32, #tpu.memory_space<vmem>>, vector<32x32xf32>
    %cst_8 = arith.constant dense<0.000000e+00> : vector<32x8xf32>
    %9 = tpu.matmul %8, %7, %cst_8 {dimension_numbers = #tpu.dot_dimension_numbers<[1], [0], [0], [1], [0, 0, 1, 1], [], []>} : vector<32x32xf32>, vector<32x8xf32>, vector<32x8xf32> -> vector<32x8xf32>
    %c0_9 = arith.constant 0 : index
    %c0_10 = arith.constant 0 : index
    %10 = vector.load %arg5[%c0_9, %c0_10] : memref<32x1xf32, #tpu.memory_space<vmem>>, vector<32x1xf32>
    %11 = vector.broadcast %10 : vector<32x1xf32> to vector<32x8xf32>
    %12 = arith.addf %9, %11 : vector<32x8xf32>
    %cst_11 = arith.constant 0.000000e+00 : f32
    %13 = vector.broadcast %cst_11 : f32 to vector<32x8xf32>
    %14 = arith.maximumf %12, %13 : vector<32x8xf32>
    %15 = tpu.transpose %14, [1, 0] : vector<32x8xf32> -> vector<8x32xf32>
    %c0_12 = arith.constant 0 : index
    %c0_13 = arith.constant 0 : index
    %16 = vector.load %arg6[%c0_12, %c0_13] : memref<32x10xf32, #tpu.memory_space<vmem>>, vector<32x10xf32>
    %cst_14 = arith.constant dense<0.000000e+00> : vector<8x10xf32>
    %17 = tpu.matmul %15, %16, %cst_14 {dimension_numbers = #tpu.dot_dimension_numbers<[1], [0], [0], [1], [0, 0, 1, 1], [], []>} : vector<8x32xf32>, vector<32x10xf32>, vector<8x10xf32> -> vector<8x10xf32>
    %c0_15 = arith.constant 0 : index
    %c0_16 = arith.constant 0 : index
    %18 = vector.load %arg7[%c0_15, %c0_16] : memref<1x10xf32, #tpu.memory_space<vmem>>, vector<1x10xf32>
    %19 = vector.broadcast %18 : vector<1x10xf32> to vector<8x10xf32>
    %20 = arith.addf %17, %19 : vector<8x10xf32>
    %c0_17 = arith.constant 0 : index
    %c0_18 = arith.constant 0 : index
    %21 = vector.load %arg8[%c0_17, %c0_18] : memref<8x10xf32, #tpu.memory_space<vmem>>, vector<8x10xf32>
    tpu.vector_store %arg8[%c0_17, %c0_18], %20 {strides = array<i32>} : memref<8x10xf32, #tpu.memory_space<vmem>>, vector<8x10xf32>,
    return
  }
  func.func @transform_0(%arg0: i32) -> (i32, i32) {
    %c0_i32 = arith.constant 0 : i32
    %c0_i32_0 = arith.constant 0 : i32
    return %arg0, %c0_i32 : i32, i32
  }
  func.func @transform_1(%arg0: i32) -> (i32, i32) {
    %c0_i32 = arith.constant 0 : i32
    %c0_i32_0 = arith.constant 0 : i32
    %c0_i32_1 = arith.constant 0 : i32
    return %c0_i32, %c0_i32_0 : i32, i32
  }
  func.func @transform_2(%arg0: i32) -> (i32, i32) {
    %c0_i32 = arith.constant 0 : i32
    %c0_i32_0 = arith.constant 0 : i32
    %c0_i32_1 = arith.constant 0 : i32
    return %c0_i32, %c0_i32_0 : i32, i32
  }
  func.func @transform_3(%arg0: i32) -> (i32, i32) {
    %c0_i32 = arith.constant 0 : i32
    %c0_i32_0 = arith.constant 0 : i32
    %c0_i32_1 = arith.constant 0 : i32
    return %c0_i32, %c0_i32_0 : i32, i32
  }
  func.func @transform_4(%arg0: i32) -> (i32, i32) {
    %c0_i32 = arith.constant 0 : i32
    %c0_i32_0 = arith.constant 0 : i32
    %c0_i32_1 = arith.constant 0 : i32
    return %c0_i32, %c0_i32_0 : i32, i32
  }
  func.func @transform_5(%arg0: i32) -> (i32, i32) {
    %c0_i32 = arith.constant 0 : i32
    %c0_i32_0 = arith.constant 0 : i32
    %c0_i32_1 = arith.constant 0 : i32
    return %c0_i32, %c0_i32_0 : i32, i32
  }
  func.func @transform_6(%arg0: i32) -> (i32, i32) {
    %c0_i32 = arith.constant 0 : i32
    %c0_i32_0 = arith.constant 0 : i32
    %c0_i32_1 = arith.constant 0 : i32
    return %c0_i32, %c0_i32_0 : i32, i32
  }
  func.func @transform_7(%arg0: i32) -> (i32, i32) {
    %c0_i32 = arith.constant 0 : i32
    %c0_i32_0 = arith.constant 0 : i32
    return %arg0, %c0_i32 : i32, i32
  }
}

</mosaic_0001>

<bundles_post_ra>
// kernel: tpu_custom_call.1
= control target key start
LH: loop header
LB: loop body
LE: loop exit
PB: predicated region body
PF: predicated region fallthrough
CT: control target
= control target key end

     0   :  { %vm56_vm0 = vcmask 130048   ;;  %v513_v4 = vmov 0   ;;  %s637_s0 = inlined_call_operand.vmem [shape: f32[8,16], index: 0, kind: input, shape index: {}]   ;;  %s638_s1 = inlined_call_operand.vmem [shape: f32[32,16], index: 1, kind: input, shape index: {}]   ;;  %s639_s2 = inlined_call_operand.vmem [shape: f32[32,1], index: 2, kind: input, shape index: {}]   ;;  %s640_s3 = inlined_call_operand.vmem [shape: f32[32,32], index: 3, kind: input, shape index: {}]   ;;  %s641_s4 = inlined_call_operand.vmem [shape: f32[32,1], index: 4, kind: input, shape index: {}]   ;;  %s642_s5 = inlined_call_operand.vmem [shape: f32[32,10], index: 5, kind: input, shape index: {}]   ;;  %s643_s6 = inlined_call_operand.vmem [shape: f32[1,10], index: 6, kind: input, shape index: {}]   ;;  %s644_s7 = inlined_call_operand.hbm [shape: f32[8,10], index: 7, kind: output, shape index: {}]  }
   0x1   :  { %v27_v0 = vld [vmem:[%s637_s0] sm:$0xff]  ;;  %v35_v2 = vld [vmem:[%s639_s2 + $0x18] sm:$0xff]  ;;  %v29_v3 = vld [vmem:[%s638_s1 + $0x8] sm:$0xff]  ;;  %489 = vset.pattern.permute.xlu0 %v513_v4  ;;  %490 = vset.pattern.permute.xlu1 %v513_v4 }
   0x2   :  { %v28_v1 = vld [vmem:[%s638_s1] sm:$0xff]  ;;  %452 = vmatprep.subr.msk.mxu0 %vm56_vm0, %v27_v0  ;;  %v33_v5 = vld [vmem:[%s639_s2 + $0x8] sm:$0xff]  ;;  %v30_v6 = vld [vmem:[%s638_s1 + $0x10] sm:$0xff]  ;;  %53 = vperm.xlu0 %489, %v35_v2  }
   0x3   :  { %454 = vmatprep.mubr.msk.f32.mxu0 %vm56_vm0, %v28_v1  ;;  %453 = vmatpush3.xpose.msk.msra.mxu0 %vm56_vm0, %v27_v0  ;;  %v34_v7 = vld [vmem:[%s639_s2 + $0x10] sm:$0xff] }
   0x4   :  { %43 = vperm.xlu1 %490, %v33_v5  }
   0x5   :  { %12 = vsyncpa [#allocation3], 0  ;;  %v32_v8 = vld [vmem:[%s639_s2] sm:$0xff]  ;;  %v31_v9 = vld [vmem:[%s638_s1 + $0x18] sm:$0xff]  ;;  %vm189_vm1 = vcmask 261120   ;;  %v514_v35 = vmov 0.0  }
   0x6   :  { %455 = vmatmul.mubr.msk.f32.vlgmr.msra.gmra.mxu0 %vm56_vm0, %v29_v3  ;;  %48 = vperm.xlu0 %489, %v34_v7   ;;  %v165_v10 = vld [vmem:[%s641_s4] sm:$0xff]  ;;  %v166_v11 = vld [vmem:[%s641_s4 + $0x8] sm:$0xff]  ;;  %v167_v12 = vld [vmem:[%s641_s4 + $0x10] sm:$0xff]  ;;  %vm515_vm2 = vmmov 0   ;;  %s516_s15 = smov [#allocation2]   ;;  %vm407_vm3 = vcmask 80896  }
   0x7   :  { %457 = vmatprep.mubr.msk.f32.mxu0 %vm56_vm0, %v30_v6  ;;  %v168_v13 = vld [vmem:[%s641_s4 + $0x18] sm:$0xff]  ;;  %v161_v14 = vld [vmem:[%s640_s3] sm:$0xff]  ;;  %v162_v31 = vld [vmem:[%s640_s3 + $0x8] sm:$0xff]  ;;  %474 = vmatprep.subr.mxu0 %v514_v35  ;;  %s415_s16 = sshll.u32 %s516_s15, 4  ;;  %s416_s16 = int_to_ptr.vmem [resolvable:$true] %s415_s16 }
   0x8   :  { %38 = vperm.xlu1 %490, %v32_v8   ;;  %468 = vmatprep.mubr.msk.f32.mxu1 %vm189_vm1, %v161_v14  ;;  %v163_v32 = vld [vmem:[%s640_s3 + $0x10] sm:$0xff]  ;;  %v164_v33 = vld [vmem:[%s640_s3 + $0x18] sm:$0xff]  ;;  %v324_v37 = vld [vmem:[%s642_s5 + $0x8] sm:$0xff]  ;;  %s491_s17 = scalar_lea.vmem %s416_s16, 128  ;;  %p496_p1 = scmp.lt.s32.totalorder %s416_s16, %s416_s16 }
   0x9   :  { %v326_v34 = vld [vmem:[%s642_s5 + $0x18] sm:$0xff]  ;;  %v325_v36 = vld [vmem:[%s642_s5 + $0x10] sm:$0xff]  ;;  %v323_v38 = vld [vmem:[%s642_s5] sm:$0xff]  ;;  %p492_p0 = scmp.ne.s32.totalorder %s416_s16, %s491_s17  ;;  %p497_p2 = scmp.lt.s32.totalorder %s491_s17, %s491_s17 }
   0xa   :  { %458 = vmatmul.mubr.msk.f32.gmra.mxu0 %vm56_vm0, %v31_v9  ;;  %171 = vperm.xlu0 %489, %v165_v10   ;;  %v432_v56 = vld [vmem:[%s643_s6] ss:$0 sm:$0xff] }
   0xb   :  { %482 = vmatprep.mubr.msk.f32.mxu0 %vm515_vm2, %v514_v35  ;;  %475 = vmatpush3.msra.mxu0 %v326_v34  ;;  %p498_p3 = por %p497_p2, %p496_p1 }
   0xc   :  { %176 = vperm.xlu1 %490, %v166_v11   ;;  %476 = vmatprep.subr.mxu0 %v514_v35 }
   0xd   :  { %477 = vmatpush3.msra.mxu0 %v325_v36  ;;  %p499_p4 = pnand %p498_p3, %p492_p0 }
   0xe   :  { %181 = vperm.xlu0 %489, %v167_v12   ;;  %478 = vmatprep.subr.mxu0 %v514_v35 }
   0xf   :  { %479 = vmatpush3.msra.mxu0 %v324_v37 }
  0x10   :  { %186 = vperm.xlu1 %490, %v168_v13   ;;  %480 = vmatprep.subr.mxu0 %v514_v35 }
  0x11   :  { %481 = vmatpush3.msra.mxu0 %v323_v38 }
  0x7d   :  { %v54_v15 = vpop.permute.xlu0 %53 }
  0x7f   :  { %v44_v17 = vpop.permute.xlu1 %43 }
  0x81   :  { %v49_v21 = vpop.permute.xlu0 %48 }
  0x83   :  { %v39_v26 = vpop.permute.xlu1 %38 }
  0x85   :  { %v172_v40 = vpop.permute.xlu0 %171 }
  0x87   :  { %v177_v43 = vpop.permute.xlu1 %176 }
  0x89   :  { %v182_v48 = vpop.permute.xlu0 %181 }
  0x8b   :  { %v187_v51 = vpop.permute.xlu1 %186 }
  0xc6   :  { %v456_v16 = vpop.f32.mrf.mxu0 }
  0xc7   :  { %v144_v23 = vadd.f32 %v456_v16, %v44_v17 }
  0xc8   :  { %v138_v18 = vpop.f32.mrf.mxu0 }
  0xc9   :  { %v139_v27 = vadd.f32 %v138_v18, %v39_v26  ;;  %v158_v29 = vmax.f32 %v144_v23, 0.0 }
  0xca   :  { %v459_v19 = vpop.f32.mrf.mxu0 }
  0xcb   :  { %v154_v20 = vadd.f32 %v459_v19, %v54_v15  ;;  %v157_v30 = vmax.f32 %v139_v27, 0.0 }
  0xcc   :  { %v148_v22 = vpop.f32.mrf.mxu0 }
  0xcd   :  { %v160_v24 = vmax.f32 %v154_v20, 0.0  ;;  %v149_v25 = vadd.f32 %v148_v22, %v49_v21 }
  0xcf   :  { %v159_v28 = vmax.f32 %v149_v25, 0.0  ;;  %460 = vmatprep.subr.mxu1 %v160_v24 }
  0xd0   :  { %461 = vmatpush3.msra.mxu1 %v160_v24 }
  0xd1   :  { %462 = vmatprep.subr.mxu1 %v159_v28 }
  0xd2   :  { %463 = vmatpush3.msra.mxu1 %v159_v28 }
  0xd3   :  { %464 = vmatprep.subr.mxu1 %v158_v29 }
  0xd4   :  { %465 = vmatpush3.msra.mxu1 %v158_v29 }
  0xd5   :  { %466 = vmatprep.subr.mxu1 %v157_v30 }
  0xd6   :  { %467 = vmatpush3.msra.mxu1 %v157_v30 }
  0xd7   :  { %469 = vmatmul.mubr.msk.f32.vlgmr.msra.gmra.mxu1 %vm189_vm1, %v162_v31 }
  0xd8   :  { %471 = vmatprep.mubr.msk.f32.mxu1 %vm189_vm1, %v163_v32 }
  0xdb   :  { %472 = vmatmul.mubr.msk.f32.gmra.mxu1 %vm189_vm1, %v164_v33 }
 0x197   :  { %v470_v39 = vpop.f32.mrf.mxu1 }
 0x198   :  { %v274_v45 = vadd.f32 %v470_v39, %v177_v43 }
 0x199   :  { %v268_v41 = vpop.f32.mrf.mxu1 }
 0x19a   :  { %v269_v42 = vadd.f32 %v268_v41, %v172_v40  ;;  %v288_v49 = vmax.f32 %v274_v45, 0.0 }
 0x19b   :  { %v473_v44 = vpop.f32.mrf.mxu1 }
 0x19c   :  { %v287_v46 = vmax.f32 %v269_v42, 0.0  ;;  %v284_v52 = vadd.f32 %v473_v44, %v187_v51 }
 0x19d   :  { %v278_v47 = vpop.f32.mrf.mxu1 }
 0x19e   :  { %291 = vxpose.xlu0.b32.start [1/4] (short) (narrow) %v287_v46, 8  ;;  %v279_v50 = vadd.f32 %v278_v47, %v182_v48  ;;  %v290_v54 = vmax.f32 %v284_v52, 0.0 }
 0x1a0   :  { %v289_v53 = vmax.f32 %v279_v50, 0.0 }
 0x1a2   :  { %292 = vxpose.xlu0.b32.cont [2/4] (short) (narrow) %v288_v49, 8 }
 0x1a6   :  { %293 = vxpose.xlu0.b32.cont [3/4] (short) (narrow) %v289_v53, 8 }
 0x1aa   :  { %294 = vxpose.xlu0.b32.end [4/4] (short) (narrow) %v290_v54, 8 }
 0x21a   :  { %v307_v55 = vpop.trf.xlu0 }
 0x21b   :  { %483 = vmatmul.mubr.msk.f32.vlgmr.msra.gmra.mxu0 %vm189_vm1, %v307_v55 }
 0x2db   :  { %v403_v57 = vpop.f32.mrf.mxu0 }
 0x2dc   :  { %v404_v58 = vadd.f32 %v432_v56, %v403_v57 }
 0x2dd   :  { %v484_v59 = vpop.f32.mrf.mxu0 }
 0x2de   :  { %408 = vst.msk [vmem:[#allocation2] sm:$0xff] %vm407_vm3, %v404_v58 }
 0x2df   :  { %502 = shalt.err (!%p499_p4)
}
 0x2e0   :  { %418 = dma.vmem_to_hbm [thread:$0]  %s416_s16, 128, %s644_s7, [#allocation3]  }
 0x2e1   :  { %511 = dma.done.wait [#allocation3], 128  }
 0x2e2   :  { %512 = vsyncadd [#allocation3], 4294967168 }
 0x2e3   :  { %422 = vsyncpa [#allocation3], 1 }

</bundles_post_ra>
